<compile_context>
chip_gen: v5e
topology: v5e:2x2
jax: 0.10.0
libtpu: 0.0.40
codegen_flags: <defaults>
</compile_context>

<pallas_src>
import jax
import jax.numpy as jnp
from jax.experimental import pallas as pl
from jax.experimental.pallas import tpu as pltpu


def _round_up(x, m):
    return ((x + m - 1) // m) * m


def _make_gather_kernel(tokens_per_step):
    TB = tokens_per_step

    def kernel(ids_ref, table_hbm, o_ref, row_buf, sems):
        # ids_ref : SMEM (n_pad,) int32           (scalar prefetch)
        # table_hbm: HBM  (V, dim)                (memory_space=pl.ANY)
        # o_ref   : VMEM (TB, dim) output block
        # row_buf : VMEM (TB, dim) gather staging buffer
        # sems    : DMA semaphores, one per row copy
        t = pl.program_id(0)
        base = t * TB

        # Issue one row DMA per token of this tile (HBM gather -> VMEM slab).
        @pl.loop(0, TB)
        def _issue(i):
            row = ids_ref[base + i]
            pltpu.make_async_copy(
                table_hbm.at[pl.ds(row, 1), :],
                row_buf.at[pl.ds(i, 1), :],
                sems.at[i],
            ).start()

        # Wait for all row DMAs of this tile.
        @pl.loop(0, TB)
        def _wait(i):
            row = ids_ref[base + i]
            pltpu.make_async_copy(
                table_hbm.at[pl.ds(row, 1), :],
                row_buf.at[pl.ds(i, 1), :],
                sems.at[i],
            ).wait()

        # Single dense (TB, dim) store to the pipelined output block.
        o_ref[...] = row_buf[...]

    return kernel


def glove_embedding_lookup(ids, table, *, tokens_per_step=128):
    """Pallas TPU equivalent of nn.Embedding.from_pretrained(table)(ids).

    ids  : int array of any shape (token indices into the vocabulary)
    table: (V, dim) float embedding table
    returns ids.shape + (dim,) array of gathered rows.
    """
    orig_shape = ids.shape
    V, dim = table.shape

    flat = ids.reshape(-1).astype(jnp.int32)
    n = flat.shape[0]

    # Tile of tokens handled per grid step (multiple of 8 for sublane density).
    TB = min(int(tokens_per_step), _round_up(n, 8))
    n_pad = _round_up(n, TB)
    if n_pad != n:
        # Pad with index 0 (always a valid row); padded rows are sliced off below.
        flat = jnp.concatenate([flat, jnp.zeros((n_pad - n,), jnp.int32)])
    num_tiles = n_pad // TB

    out = pl.pallas_call(
        _make_gather_kernel(TB),
        out_shape=jax.ShapeDtypeStruct((n_pad, dim), table.dtype),
        grid_spec=pltpu.PrefetchScalarGridSpec(
            num_scalar_prefetch=1,            # token ids -> SMEM
            grid=(num_tiles,),
            in_specs=[
                pl.BlockSpec(memory_space=pl.ANY),   # table stays in HBM
            ],
            out_specs=pl.BlockSpec((TB, dim), lambda t, ids: (t, 0)),
            scratch_shapes=[
                pltpu.VMEM((TB, dim), table.dtype),   # gather staging slab
                pltpu.SemaphoreType.DMA((TB,)),       # one sem per row copy
            ],
        ),
        compiler_params=pltpu.CompilerParams(
            dimension_semantics=("parallel",),        # tiles are independent
        ),
    )(flat, table)

    return out[:n].reshape(*orig_shape, dim)


def _build_embedding_table(key, vocab_size, dim, padding_idx=0):
    """Deterministic stand-in for GloveEmbedding._get_weights()."""
    table = jax.random.uniform(key, (vocab_size, dim), jnp.float32, -0.25, 0.25)
    if padding_idx is not None:
        table = table.at[padding_idx].set(0.0)
    return table


def reference_forward(ids, table):
    """Pure-JAX reference of nn.Embedding forward (row gather)."""
    return jnp.take(table, ids, axis=0)


if __name__ == "__main__":
    # Small shapes consistent with the module: a word-embedding table and
    # integer token-id inputs.
    VOCAB, DIM = 512, 64          # vocab size, embedding dim
    PAD_IDX = 0

    key = jax.random.PRNGKey(0)
    k_tab, k_id1, k_id2 = jax.random.split(key, 3)

    table = _build_embedding_table(k_tab, VOCAB, DIM, padding_idx=PAD_IDX)

    # Case 1: (batch=2, seq=8) token ids.
    ids1 = jax.random.randint(k_id1, (2, 8), 0, VOCAB, dtype=jnp.int32)
    out1 = jax.block_until_ready(glove_embedding_lookup(ids1, table))
    ref1 = reference_forward(ids1, table)
    assert out1.shape == (2, 8, DIM)
    assert jnp.allclose(out1, ref1), (
        f"max abs err = {jnp.max(jnp.abs(out1 - ref1))}")

    # Case 2: non-multiple-of-tile token count (exercises the padding path).
    ids2 = jax.random.randint(k_id2, (3, 5), 0, VOCAB, dtype=jnp.int32)
    out2 = jax.block_until_ready(glove_embedding_lookup(ids2, table))
    ref2 = reference_forward(ids2, table)
    assert out2.shape == (3, 5, DIM)
    assert jnp.allclose(out2, ref2), (
        f"max abs err = {jnp.max(jnp.abs(out2 - ref2))}")

    print("KERNEL_OK")
</pallas_src>

<mosaic_0001>
module attributes {stable_mosaic.version = 11 : i64} {
  func.func @kernel(%arg0: i32, %arg1: memref<16xi32, #tpu.memory_space<smem>>, %arg2: memref<512x64xf32, #tpu.memory_space<any>>, %arg3: memref<16x64xf32, #tpu.memory_space<vmem>>, %arg4: memref<16x64xf32, #tpu.memory_space<vmem>>, %arg5: memref<16x!tpu.dma_semaphore, #tpu.memory_space<semaphore_mem>>) attributes {dimension_semantics = [#tpu.dimension_semantics<parallel>], iteration_bounds = array<i64: 1>, scalar_prefetch = 1 : i64, scratch_operands = 2 : i64, tpu.core_type = #tpu.core_type<tc>, window_params = [{}, {transform_indices = @transform_1, window_bounds = array<i64: 16, 64>}]} {
    %c16_i32 = arith.constant 16 : i32
    %0 = arith.muli %arg0, %c16_i32 : i32
    %c0_i32 = arith.constant 0 : i32
    %c16_i32_0 = arith.constant 16 : i32
    %1 = arith.addi %c0_i32, %c16_i32_0 : i32
    %c1_i32 = arith.constant 1 : i32
    scf.for %arg6 = %c0_i32 to %1 step %c1_i32  : i32 {
      %c1_i32_9 = arith.constant 1 : i32
      %5 = arith.muli %arg6, %c1_i32_9 : i32
      %c0_i32_10 = arith.constant 0 : i32
      %6 = arith.addi %c0_i32_10, %5 : i32
      %7 = arith.addi %0, %6 : i32
      %8 = arith.index_cast %7 : i32 to index
      %9 = memref.load %arg1[%8] : memref<16xi32, #tpu.memory_space<smem>>
      %c0_i32_11 = arith.constant 0 : i32
      %10 = tpu.memref_slice %arg2[%9, %c0_i32_11] : memref<512x64xf32, #tpu.memory_space<any>> -> memref<1x64xf32, #tpu.memory_space<any>>
      %c0_i32_12 = arith.constant 0 : i32
      %11 = tpu.memref_slice %arg4[%6, %c0_i32_12] : memref<16x64xf32, #tpu.memory_space<vmem>> -> memref<1x64xf32, #tpu.memory_space<vmem>>
      %12 = tpu.memref_slice %arg5[%6] : memref<16x!tpu.dma_semaphore, #tpu.memory_space<semaphore_mem>> -> memref<1x!tpu.dma_semaphore, #tpu.memory_space<semaphore_mem>>
      %13 = tpu.memref_squeeze %12 : memref<1x!tpu.dma_semaphore, #tpu.memory_space<semaphore_mem>> -> memref<!tpu.dma_semaphore, #tpu.memory_space<semaphore_mem>>
      tpu.enqueue_dma source(%10 : memref<1x64xf32, #tpu.memory_space<any>>) target(%11 : memref<1x64xf32, #tpu.memory_space<vmem>>) target_semaphore(%13 : memref<!tpu.dma_semaphore, #tpu.memory_space<semaphore_mem>>)
    }
    %c16_i32_1 = arith.constant 16 : i32
    %c0_i32_2 = arith.constant 0 : i32
    %c16_i32_3 = arith.constant 16 : i32
    %2 = arith.addi %c0_i32_2, %c16_i32_3 : i32
    %c1_i32_4 = arith.constant 1 : i32
    scf.for %arg6 = %c0_i32_2 to %2 step %c1_i32_4  : i32 {
      %c1_i32_9 = arith.constant 1 : i32
      %5 = arith.muli %arg6, %c1_i32_9 : i32
      %c0_i32_10 = arith.constant 0 : i32
      %6 = arith.addi %c0_i32_10, %5 : i32
      %7 = arith.addi %0, %6 : i32
      %8 = arith.index_cast %7 : i32 to index
      %9 = memref.load %arg1[%8] : memref<16xi32, #tpu.memory_space<smem>>
      %c0_i32_11 = arith.constant 0 : i32
      %10 = tpu.memref_slice %arg2[%9, %c0_i32_11] : memref<512x64xf32, #tpu.memory_space<any>> -> memref<1x64xf32, #tpu.memory_space<any>>
      %c0_i32_12 = arith.constant 0 : i32
      %11 = tpu.memref_slice %arg4[%6, %c0_i32_12] : memref<16x64xf32, #tpu.memory_space<vmem>> -> memref<1x64xf32, #tpu.memory_space<vmem>>
      %12 = tpu.memref_slice %arg5[%6] : memref<16x!tpu.dma_semaphore, #tpu.memory_space<semaphore_mem>> -> memref<1x!tpu.dma_semaphore, #tpu.memory_space<semaphore_mem>>
      %13 = tpu.memref_squeeze %12 : memref<1x!tpu.dma_semaphore, #tpu.memory_space<semaphore_mem>> -> memref<!tpu.dma_semaphore, #tpu.memory_space<semaphore_mem>>
      tpu.wait_dma2 semaphore(%13 : memref<!tpu.dma_semaphore, #tpu.memory_space<semaphore_mem>>) src(%10 : memref<1x64xf32, #tpu.memory_space<any>>) dst(%11 : memref<1x64xf32, #tpu.memory_space<vmem>>)
    }
    %c16_i32_5 = arith.constant 16 : i32
    %c0 = arith.constant 0 : index
    %c0_6 = arith.constant 0 : index
    %3 = vector.load %arg4[%c0, %c0_6] : memref<16x64xf32, #tpu.memory_space<vmem>>, vector<16x64xf32>
    %c0_7 = arith.constant 0 : index
    %c0_8 = arith.constant 0 : index
    %4 = vector.load %arg3[%c0_7, %c0_8] : memref<16x64xf32, #tpu.memory_space<vmem>>, vector<16x64xf32>
    tpu.vector_store %arg3[%c0_7, %c0_8], %3 {strides = array<i32>} : memref<16x64xf32, #tpu.memory_space<vmem>>, vector<16x64xf32>,
    return
  }
  func.func @transform_1(%arg0: i32, %arg1: memref<16xi32, #tpu.memory_space<smem>>) -> (i32, i32) {
    %c0_i32 = arith.constant 0 : i32
    %c0_i32_0 = arith.constant 0 : i32
    return %arg0, %c0_i32 : i32, i32
  }
}

</mosaic_0001>

<bundles_post_ra>
// kernel: tpu_custom_call.1
= control target key start
LH: loop header
LB: loop body
LE: loop exit
PB: predicated region body
PF: predicated region fallthrough
CT: control target
= control target key end

     0   :  { %s320_s12 = smov [#allocation5]   ;;  %s348_s0 = inlined_call_operand.vmem [shape: s32[16], index: 0, kind: input, shape index: {}]   ;;  %s349_s1 = inlined_call_operand.vmem [shape: f32[512,64], index: 1, kind: input, shape index: {}]   ;;  %s350_s2 = inlined_call_operand.hbm [shape: f32[16,64], index: 2, kind: output, shape index: {}]  }
   0x1   :  { %s8_s11 = sshll.u32 %s348_s0, 4  ;;  %s9_s11 = int_to_ptr.vmem [resolvable:$true] %s8_s11 }
   0x2   :  { %11 = dma.vmem_to_smem %s9_s11, 16, %s320_s12, [#allocation4] }
   0x3   :  { %306 = dma.done.wait [#allocation4], 16 }
   0x4   :  { %307 = vsyncadd [#allocation4], 4294967280 }
   0x5   :  { %14 = sfence }
   0x6   :  { %15 = vsyncpa [#allocation7], 0  ;;  %s312_s13 = smov 0  }
   0x7 LB: > { %s24_s14 = sld [smem:[#allocation5 + %s314_s13]]  ;;  %s26_s18 = scalar_lea.vmem [#allocation2], %s314_s13  ;;  %s314_s13 = sphi %s312_s13, %s22_s13  }
   0x8   : > { %s27_s0 = scalar_lea.sflag [#allocation3], %s314_s13 }
   0xd   : > { %s25_s17 = scalar_lea.vmem %s349_s1, %s24_s14 }
   0xe   : > { %v42_v0 = vld [vmem:[%s25_s17] sm:$0x1] }
   0xf   : > { %43 = vst [vmem:[%s26_s18] sm:$0x1] %v42_v0 }
  0x10   : > { %61 = vsyncadd %s27_s0, 16  ;;  %s22_s13 = sadd.s32 1, %s314_s13  }
  0x11   : > { %p19_p0 = scmp.ge.s32.totalorder %s22_s13, 16  }
  0x12   :  { %s316_s19 = smov (%p19_p0), 0  }
  0x13   :  { %21 = sbr.rel (!%p19_p0) target bundleno = 7 (0x7), region = 87 }
  0x18 LB: > { %s70_s20 = scalar_lea.sflag [#allocation3], %s318_s19  ;;  %s318_s19 = sphi %s316_s19, %s67_s19  }
  0x19   : > { %308 = dma.done.wait %s70_s20, 16 }
  0x1a   : > { %309 = vsyncadd %s70_s20, 4294967280  ;;  %s67_s19 = sadd.s32 1, %s318_s19  }
  0x1b   : > { %p64_p1 = scmp.ge.s32.totalorder %s67_s19, 16  }
  0x1c   :  { %v74_v1 = vld [vmem:[#allocation2] sm:$0xff] (%p64_p1)  ;;  %vm76_vm0 = vcmask (%p64_p1), 523264   ;;  %v75_v2 = vld [vmem:[#allocation2 + $0x8] sm:$0xff] (%p64_p1)  ;;  %s85_s23 = sshll.u32 (%p64_p1), %s350_s2, 4  ;;  %s321_s24 = smov (%p64_p1), [#allocation6]   ;;  %s86_s23 = int_to_ptr.hbm [resolvable:$true] %s85_s23 }
  0x1d   :  { %66 = sbr.rel (!%p64_p1) target bundleno = 24 (0x18), region = 98  ;;  %77 = vst.msk [vmem:[#allocation6] sm:$0xff] (%p64_p1), %vm76_vm0, %v74_v1  ;;  %s83_s1 = sshll.u32 (%p64_p1), %s321_s24, 4  ;;  %s84_s1 = int_to_ptr.vmem [resolvable:$true] %s83_s1 }
  0x1e   :  { %78 = vst.msk [vmem:[#allocation6 + $0x8] sm:$0xff] (%p64_p1), %vm76_vm0, %v75_v2  ;;  %s322_s25 = smov (%p64_p1), 128   ;;  %s323_s26 = smov (%p64_p1), 8  }
  0x1f   :  { %91 = dma.vmem_to_hbm [thread:$0]  (%p64_p1), %s84_s1, 256, %s86_s23, [#allocation7], %s322_s25, %s322_s25, %s323_s26  }
  0x22   :  { %310 = dma.done.wait [#allocation7], 256  }
  0x23   :  { %311 = vsyncadd [#allocation7], 4294967040 }
  0x24   :  { %96 = vsyncpa [#allocation7], 1 }
  0x25   :  { %97 = vsyncmov [#allocation3] }
  0x28   :  { %s98_s27 = vpop.sfrf %97 }
  0x29   :  { %p226_p2 = scmp.ne.s32.totalorder %s98_s27, 0 }
  0x2b   :  { %102 = shalt.err (%p226_p2)  }
  0x2c   :  { %104 = vsyncmov [#allocation3 + $0x1] }
  0x2f   :  { %s105_s28 = vpop.sfrf %104 }
  0x30   :  { %p227_p3 = scmp.ne.s32.totalorder %s105_s28, 0 }
  0x32   :  { %109 = shalt.err (%p227_p3)  }
  0x33   :  { %111 = vsyncmov [#allocation3 + $0x2] }
  0x36   :  { %s112_s2 = vpop.sfrf %111 }
  0x37   :  { %p228_p4 = scmp.ne.s32.totalorder %s112_s2, 0 }
  0x39   :  { %116 = shalt.err (%p228_p4)  }
  0x3a   :  { %118 = vsyncmov [#allocation3 + $0x3] }
  0x3d   :  { %s119_s29 = vpop.sfrf %118 }
  0x3e   :  { %p229_p5 = scmp.ne.s32.totalorder %s119_s29, 0 }
  0x40   :  { %123 = shalt.err (%p229_p5)  }
  0x41   :  { %125 = vsyncmov [#allocation3 + $0x4] }
  0x44   :  { %s126_s30 = vpop.sfrf %125 }
  0x45   :  { %p230_p6 = scmp.ne.s32.totalorder %s126_s30, 0 }
  0x47   :  { %130 = shalt.err (%p230_p6)  }
  0x48   :  { %132 = vsyncmov [#allocation3 + $0x5] }
  0x4b   :  { %s133_s3 = vpop.sfrf %132 }
  0x4c   :  { %p231_p7 = scmp.ne.s32.totalorder %s133_s3, 0 }
  0x4e   :  { %137 = shalt.err (%p231_p7)  }
  0x4f   :  { %139 = vsyncmov [#allocation3 + $0x6] }
  0x52   :  { %s140_s4 = vpop.sfrf %139 }
  0x53   :  { %p232_p8 = scmp.ne.s32.totalorder %s140_s4, 0 }
  0x55   :  { %144 = shalt.err (%p232_p8)  }
  0x56   :  { %146 = vsyncmov [#allocation3 + $0x7] }
  0x59   :  { %s147_s5 = vpop.sfrf %146 }
  0x5a   :  { %p233_p9 = scmp.ne.s32.totalorder %s147_s5, 0 }
  0x5c   :  { %151 = shalt.err (%p233_p9)  }
  0x5d   :  { %153 = vsyncmov [#allocation3 + $0x8] }
  0x60   :  { %s154_s6 = vpop.sfrf %153 }
  0x61   :  { %p234_p10 = scmp.ne.s32.totalorder %s154_s6, 0 }
  0x63   :  { %158 = shalt.err (%p234_p10)  }
  0x64   :  { %160 = vsyncmov [#allocation3 + $0x9] }
  0x67   :  { %s161_s7 = vpop.sfrf %160 }
  0x68   :  { %p235_p11 = scmp.ne.s32.totalorder %s161_s7, 0 }
  0x6a   :  { %165 = shalt.err (%p235_p11)  }
  0x6b   :  { %167 = vsyncmov [#allocation3 + $0xa] }
  0x6e   :  { %s168_s8 = vpop.sfrf %167 }
  0x6f   :  { %p236_p12 = scmp.ne.s32.totalorder %s168_s8, 0 }
  0x71   :  { %172 = shalt.err (%p236_p12)  }
  0x72   :  { %174 = vsyncmov [#allocation3 + $0xb] }
  0x75   :  { %s175_s9 = vpop.sfrf %174 }
  0x76   :  { %p237_p13 = scmp.ne.s32.totalorder %s175_s9, 0 }
  0x78   :  { %179 = shalt.err (%p237_p13)  }
  0x79   :  { %181 = vsyncmov [#allocation3 + $0xc] }
  0x7c   :  { %s182_s10 = vpop.sfrf %181 }
  0x7d   :  { %p238_p0 = scmp.ne.s32.totalorder %s182_s10, 0 }
  0x7f   :  { %186 = shalt.err (%p238_p0)  }
  0x80   :  { %188 = vsyncmov [#allocation3 + $0xd] }
  0x83   :  { %s189_s11 = vpop.sfrf %188 }
  0x84   :  { %p239_p1 = scmp.ne.s32.totalorder %s189_s11, 0 }
  0x86   :  { %193 = shalt.err (%p239_p1)  }
  0x87   :  { %195 = vsyncmov [#allocation3 + $0xe] }
  0x8a   :  { %s196_s12 = vpop.sfrf %195 }
  0x8b   :  { %p240_p2 = scmp.ne.s32.totalorder %s196_s12, 0 }
  0x8d   :  { %200 = shalt.err (%p240_p2)  }
  0x8e   :  { %202 = vsyncmov [#allocation3 + $0xf] }
  0x91   :  { %s203_s13 = vpop.sfrf %202 }
  0x92   :  { %p241_p3 = scmp.ne.s32.totalorder %s203_s13, 0 }
  0x94   :  { %207 = shalt.err (%p241_p3)  }

</bundles_post_ra>
